<compile_context>
chip_gen: v7x
topology: tpu7x:2x2x1
jax: 0.10.0
libtpu: 0.0.40
codegen_flags: <defaults>
</compile_context>

<pallas_src>
import functools

import jax
import jax.numpy as jnp
from jax.experimental import pallas as pl
from jax.experimental.pallas import tpu as pltpu


def _round_up(n, m):
    return ((n + m - 1) // m) * m


def _vmem_capacity_bytes():
    try:
        cap = int(pltpu.get_tpu_info().vmem_capacity_bytes)
        if cap > 0:
            return cap
    except Exception:
        pass
    return 64 * 1024 * 1024  # conservative fallback (v7x per-TC VMEM)


def _choose_tile_rows(Bp, Dk, k_out, x_itemsize):
    """Pick the packed-row tile and the VMEM limit for CompilerParams."""
    lane = 128
    cap = _vmem_capacity_bytes()
    vmem_limit = max(min(cap * 3 // 4, 96 * 1024 * 1024), 32 * 1024 * 1024)

    # Resident (constant index_map) tiles, lane/sublane padded, x2 for the
    # double-buffering Pallas may still apply.
    w1_res = 2 * _round_up(Dk, 8) * _round_up(16 * k_out, lane) * x_itemsize
    w2_res = 2 * _round_up(16 * k_out, 8) * _round_up(k_out, lane) * 4
    b1_res = 2 * 8 * _round_up(16 * k_out, lane) * 4
    budget = int(vmem_limit * 0.8) - (w1_res + w2_res + b1_res)

    # Per packed row: double-buffered x block + double-buffered output block.
    per_row = 2 * _round_up(Dk, lane) * x_itemsize + 2 * _round_up(k_out, lane) * 4

    align = 16 if x_itemsize < 4 else 8  # bf16 sublane packing wants 16-row tiles
    tb_budget = max(align, (budget // per_row) // align * align)
    # Target ~8 MiB of real x HBM payload per tile -> per-step overhead << 1%.
    tb_target = max(align, (8 * 1024 * 1024 // max(Dk * x_itemsize, 1)) // align * align)
    tb = min(tb_budget, tb_target)

    if tb >= Bp:
        if Bp >= 128:
            # Keep >= 2 grid steps: pipelining + lets v7x's 2 TCs split the axis.
            tb = _round_up((Bp + 1) // 2, align)
        else:
            tb = Bp  # single full-extent block (allowed even if not 8-aligned)
    return int(tb), int(vmem_limit)


def _block_diag(w, k):
    """(D, H) -> (k*D, k*H) block-diagonal replication of w."""
    if k == 1:
        return w
    D, H = w.shape
    eye = jnp.eye(k, dtype=w.dtype)
    return (eye[:, None, :, None] * w[None, :, None, :]).reshape(k * D, k * H)


def classifier_kernel(x_ref, w1_ref, b1_ref, w2_ref, b2_ref, o_ref):
    # x_ref:  (TB, Dk)       x dtype (Dk = k*D, lane-dense when packed)
    # w1_ref: (Dk, 16k)      block-diagonal layer-1 weight (resident)
    # b1_ref: (1, 16k)       f32
    # w2_ref: (16k, k)       block-diagonal layer-2 weight, f32 (resident)
    # b2_ref: (1, 1)         f32 scalar in SMEM
    # o_ref:  (TB, k)        f32
    h = jnp.dot(x_ref[...], w1_ref[...], preferred_element_type=jnp.float32)
    h = jnp.maximum(h + b1_ref[...], 0.0)                      # VPU ReLU
    z = jnp.dot(h, w2_ref[...], preferred_element_type=jnp.float32) + b2_ref[0, 0]
    # sigmoid(z) == 0.5 * tanh(0.5*z) + 0.5 -> single EUP op per vreg.
    o_ref[...] = 0.5 * jnp.tanh(0.5 * z) + 0.5


@functools.partial(jax.jit, static_argnames=("block_rows",))
def classifier_forward(x, w1, b1, w2, b2, *, block_rows=None):
    """x: (B, D) -> (B, 1).  Matches Linear(D,16)->ReLU->Linear(16,1)->Sigmoid."""
    B, D = x.shape
    assert w1.shape == (D, 16) and b1.shape == (16,)
    assert w2.shape == (16, 1) and b2.shape == (1,)

    # Row-packing factor (lane-dense x stream for narrow D).
    if D < 128 and 128 % D == 0 and B % (128 // D) == 0:
        k = 128 // D
    else:
        k = 1  # lane-padded fallback (D >= 128, D not a divisor of 128, or ragged B)

    Dk = k * D
    Bp = B // k
    in_dtype = x.dtype

    # Wrapper-side layout plumbing (all tiny except the free x reshape).
    x_p = x.reshape(Bp, Dk)                                   # free: rows contiguous in HBM
    w1_bd = _block_diag(w1.astype(in_dtype), k)               # (Dk, 16k)
    w2_bd = _block_diag(w2.astype(jnp.float32), k)            # (16k, k)
    b1_row = jnp.tile(b1.astype(jnp.float32), k).reshape(1, 16 * k)
    b2_2d = b2.reshape(1, 1).astype(jnp.float32)

    tb, vmem_limit = _choose_tile_rows(Bp, Dk, k, jnp.dtype(in_dtype).itemsize)
    if block_rows is not None:
        tb = max(1, min(int(block_rows), Bp))
        if tb < Bp:
            tb = max(8, tb // 8 * 8)

    grid = (pl.cdiv(Bp, tb),)

    out = pl.pallas_call(
        classifier_kernel,
        out_shape=jax.ShapeDtypeStruct((Bp, k), jnp.float32),
        grid=grid,
        in_specs=[
            # x: streamed per batch tile (double-buffered by Pallas); ragged last block.
            pl.BlockSpec((tb, Dk), lambda i: (i, 0)),
            # Weights/biases: constant index_map -> loaded once, VMEM-resident.
            pl.BlockSpec((Dk, 16 * k), lambda i: (0, 0)),
            pl.BlockSpec((1, 16 * k), lambda i: (0, 0)),
            pl.BlockSpec((16 * k, k), lambda i: (0, 0)),
            # b2 scalar in SMEM (no padded VMEM tile / extra vector DMA).
            pl.BlockSpec(memory_space=pltpu.MemorySpace.SMEM),
        ],
        out_specs=pl.BlockSpec((tb, k), lambda i: (i, 0)),
        compiler_params=pltpu.CompilerParams(
            dimension_semantics=("parallel",),   # lets v7x split tiles over 2 TCs
            vmem_limit_bytes=vmem_limit,         # generation-aware (v7x: 64 MiB physical)
        ),
    )(x_p, w1_bd, b1_row, w2_bd, b2_2d)

    return out.reshape(B, 1)


def init_params(key, encoded_dimension):
    # Mirrors nn.Linear default init (uniform +/- 1/sqrt(fan_in)); weights stored
    # as (in_features, out_features) for x @ W.
    k1, k2, k3, k4 = jax.random.split(key, 4)
    lim1 = 1.0 / jnp.sqrt(jnp.float32(encoded_dimension))
    lim2 = 1.0 / jnp.sqrt(jnp.float32(16))
    w1 = jax.random.uniform(k1, (encoded_dimension, 16), jnp.float32, -lim1, lim1)
    b1 = jax.random.uniform(k2, (16,), jnp.float32, -lim1, lim1)
    w2 = jax.random.uniform(k3, (16, 1), jnp.float32, -lim2, lim2)
    b2 = jax.random.uniform(k4, (1,), jnp.float32, -lim2, lim2)
    return w1, b1, w2, b2


def _reference(x, w1, b1, w2, b2):
    return jax.nn.sigmoid(jnp.maximum(x @ w1 + b1, 0.0) @ w2 + b2)


if __name__ == "__main__":
    key = jax.random.PRNGKey(0)
    encoded_dimension = 32
    kx, kp = jax.random.split(key)
    w1, b1, w2, b2 = init_params(kp, encoded_dimension)

    # Small batch: single tile, packed (k=4) path.
    x = jax.random.normal(kx, (8, encoded_dimension), jnp.float32)
    out = jax.block_until_ready(classifier_forward(x, w1, b1, w2, b2))
    ref = _reference(x, w1, b1, w2, b2)
    assert out.shape == (8, 1)
    assert jnp.allclose(out, ref, atol=1e-4, rtol=1e-4), float(jnp.max(jnp.abs(out - ref)))

    # Larger batch: >= 2 grid steps and a ragged tail block (no padding copy).
    x2 = jax.random.normal(kx, (4104, encoded_dimension), jnp.float32)
    out2 = jax.block_until_ready(classifier_forward(x2, w1, b1, w2, b2))
    ref2 = _reference(x2, w1, b1, w2, b2)
    assert out2.shape == (4104, 1)
    assert jnp.allclose(out2, ref2, atol=1e-4, rtol=1e-4), float(jnp.max(jnp.abs(out2 - ref2)))

    # Batch not divisible by the packing factor: exercises the unpacked fallback.
    x3 = jax.random.normal(kx, (10, encoded_dimension), jnp.float32)
    out3 = jax.block_until_ready(classifier_forward(x3, w1, b1, w2, b2))
    ref3 = _reference(x3, w1, b1, w2, b2)
    assert out3.shape == (10, 1)
    assert jnp.allclose(out3, ref3, atol=1e-4, rtol=1e-4), float(jnp.max(jnp.abs(out3 - ref3)))

    print("KERNEL_OK")
</pallas_src>

<mosaic_0001>
module attributes {stable_mosaic.version = 11 : i64} {
  func.func @classifier_kernel(%arg0: i32, %arg1: memref<2x128xf32, #tpu.memory_space<vmem>>, %arg2: memref<128x64xf32, #tpu.memory_space<vmem>>, %arg3: memref<1x64xf32, #tpu.memory_space<vmem>>, %arg4: memref<64x4xf32, #tpu.memory_space<vmem>>, %arg5: memref<1x1xf32, #tpu.memory_space<smem>>, %arg6: memref<2x4xf32, #tpu.memory_space<vmem>>) attributes {dimension_semantics = [#tpu.dimension_semantics<parallel>], iteration_bounds = array<i64: 1>, scalar_prefetch = 0 : i64, scratch_operands = 0 : i64, tpu.core_type = #tpu.core_type<tc>, window_params = [{transform_indices = @transform_0, window_bounds = array<i64: 2, 128>}, {pipeline_mode = #tpu.pipeline_mode<synchronous>, transform_indices = @transform_1, window_bounds = array<i64: 128, 64>}, {pipeline_mode = #tpu.pipeline_mode<synchronous>, transform_indices = @transform_2, window_bounds = array<i64: 1, 64>}, {pipeline_mode = #tpu.pipeline_mode<synchronous>, transform_indices = @transform_3, window_bounds = array<i64: 64, 4>}, {transform_indices = @transform_4, window_bounds = array<i64: 1, 1>}, {transform_indices = @transform_5, window_bounds = array<i64: 2, 4>}]} {
    %c0 = arith.constant 0 : index
    %c0_0 = arith.constant 0 : index
    %0 = vector.load %arg1[%c0, %c0_0] : memref<2x128xf32, #tpu.memory_space<vmem>>, vector<2x128xf32>
    %c0_1 = arith.constant 0 : index
    %c0_2 = arith.constant 0 : index
    %1 = vector.load %arg2[%c0_1, %c0_2] : memref<128x64xf32, #tpu.memory_space<vmem>>, vector<128x64xf32>
    %cst = arith.constant dense<0.000000e+00> : vector<2x64xf32>
    %2 = tpu.matmul %0, %1, %cst {dimension_numbers = #tpu.dot_dimension_numbers<[1], [0], [0], [1], [0, 0, 1, 1], [], []>} : vector<2x128xf32>, vector<128x64xf32>, vector<2x64xf32> -> vector<2x64xf32>
    %c0_3 = arith.constant 0 : index
    %c0_4 = arith.constant 0 : index
    %3 = vector.load %arg3[%c0_3, %c0_4] : memref<1x64xf32, #tpu.memory_space<vmem>>, vector<1x64xf32>
    %4 = vector.broadcast %3 : vector<1x64xf32> to vector<2x64xf32>
    %5 = arith.addf %2, %4 : vector<2x64xf32>
    %cst_5 = arith.constant 0.000000e+00 : f32
    %6 = vector.broadcast %cst_5 : f32 to vector<2x64xf32>
    %7 = arith.maximumf %5, %6 : vector<2x64xf32>
    %c0_6 = arith.constant 0 : index
    %c0_7 = arith.constant 0 : index
    %8 = vector.load %arg4[%c0_6, %c0_7] : memref<64x4xf32, #tpu.memory_space<vmem>>, vector<64x4xf32>
    %cst_8 = arith.constant dense<0.000000e+00> : vector<2x4xf32>
    %9 = tpu.matmul %7, %8, %cst_8 {dimension_numbers = #tpu.dot_dimension_numbers<[1], [0], [0], [1], [0, 0, 1, 1], [], []>} : vector<2x64xf32>, vector<64x4xf32>, vector<2x4xf32> -> vector<2x4xf32>
    %c0_9 = arith.constant 0 : index
    %c0_10 = arith.constant 0 : index
    %10 = memref.load %arg5[%c0_9, %c0_10] : memref<1x1xf32, #tpu.memory_space<smem>>
    %11 = vector.broadcast %10 : f32 to vector<2x4xf32>
    %12 = arith.addf %9, %11 : vector<2x4xf32>
    %cst_11 = arith.constant 5.000000e-01 : f32
    %13 = vector.broadcast %cst_11 : f32 to vector<2x4xf32>
    %14 = arith.mulf %13, %12 : vector<2x4xf32>
    %15 = math.tanh %14 : vector<2x4xf32>
    %cst_12 = arith.constant 5.000000e-01 : f32
    %16 = vector.broadcast %cst_12 : f32 to vector<2x4xf32>
    %17 = arith.mulf %16, %15 : vector<2x4xf32>
    %cst_13 = arith.constant 5.000000e-01 : f32
    %18 = vector.broadcast %cst_13 : f32 to vector<2x4xf32>
    %19 = arith.addf %17, %18 : vector<2x4xf32>
    %c0_14 = arith.constant 0 : index
    %c0_15 = arith.constant 0 : index
    %20 = vector.load %arg6[%c0_14, %c0_15] : memref<2x4xf32, #tpu.memory_space<vmem>>, vector<2x4xf32>
    tpu.vector_store %arg6[%c0_14, %c0_15], %19 {strides = array<i32>} : memref<2x4xf32, #tpu.memory_space<vmem>>, vector<2x4xf32>,
    return
  }
  func.func @transform_0(%arg0: i32) -> (i32, i32) {
    %c0_i32 = arith.constant 0 : i32
    %c0_i32_0 = arith.constant 0 : i32
    return %arg0, %c0_i32 : i32, i32
  }
  func.func @transform_1(%arg0: i32) -> (i32, i32) {
    %c0_i32 = arith.constant 0 : i32
    %c0_i32_0 = arith.constant 0 : i32
    %c0_i32_1 = arith.constant 0 : i32
    return %c0_i32, %c0_i32_0 : i32, i32
  }
  func.func @transform_2(%arg0: i32) -> (i32, i32) {
    %c0_i32 = arith.constant 0 : i32
    %c0_i32_0 = arith.constant 0 : i32
    %c0_i32_1 = arith.constant 0 : i32
    return %c0_i32, %c0_i32_0 : i32, i32
  }
  func.func @transform_3(%arg0: i32) -> (i32, i32) {
    %c0_i32 = arith.constant 0 : i32
    %c0_i32_0 = arith.constant 0 : i32
    %c0_i32_1 = arith.constant 0 : i32
    return %c0_i32, %c0_i32_0 : i32, i32
  }
  func.func @transform_4(%arg0: i32) -> (i32, i32) {
    %c0_i32 = arith.constant 0 : i32
    %c0_i32_0 = arith.constant 0 : i32
    %c0_i32_1 = arith.constant 0 : i32
    return %c0_i32, %c0_i32_0 : i32, i32
  }
  func.func @transform_5(%arg0: i32) -> (i32, i32) {
    %c0_i32 = arith.constant 0 : i32
    %c0_i32_0 = arith.constant 0 : i32
    return %arg0, %c0_i32 : i32, i32
  }
}

</mosaic_0001>

<bundles_post_ra>
// kernel: tile.9
= control target key start
LH: loop header
LB: loop body
LE: loop exit
PB: predicated region body
PF: predicated region fallthrough
CT: control target
= control target key end

     0   :  { %vm7_vm0 = vcmask 130048   ;;  %s37_s8 = smov 16   ;;  %s38_s9 = smov 32   ;;  %vm13_vm1 = vcmask 523648   ;;  %vm19_vm2 = vcmask 392448   ;;  %vm25_vm3 = vcmask 261248   ;;  %s55_s0 = inlined_call_operand.vmem [shape: f32[4,16], index: 0, kind: input, shape index: {}]   ;;  %s56_s1 = inlined_call_operand.vmem [shape: f32[1,64], index: 1, kind: output, shape index: {}]  }
   0x1   :  { %v4_v0 = vld [vmem:[%s55_s0] sm:$0xf]  ;;  %s36_s0 = smov 48  }
   0x2   :  { %5 = vst [vmem:[#allocation1] sm:$0xf] %v4_v0 }
   0x9   :  { %v10_v1 = vld [vmem:[#allocation1 + $0x3] sm:$0x1]   ;;  %v22_v2 = vld [vmem:[#allocation1 + $0x1] sm:$0x1]   ;;  %v6_v3 = vld [vmem:[#allocation1] sm:$0x1]  }
   0xa   :  { %11 = vrot.lane.b32.xlu0 %v10_v1, %s36_s0  ;;  %23 = vrot.lane.b32.xlu1 %v22_v2, %s37_s8  ;;  %v16_v4 = vld [vmem:[#allocation1 + $0x2] sm:$0x1]   ;;  %8 = vst.msk [vmem:[#allocation0] sm:$0x1] %vm7_vm0, %v6_v3  }
   0xe   :  { %17 = vrot.lane.b32.xlu0 %v16_v4, %s38_s9 }
  0x7c   :  { %v12_v5 = vpop.permute.xlu0 %11   ;;  %v24_v6 = vpop.permute.xlu1 %23  }
  0x7d   :  { %14 = vst.msk [vmem:[#allocation0] sm:$0x1] %vm13_vm1, %v12_v5  }
  0x80   :  { %v18_v7 = vpop.permute.xlu0 %17  }
  0x81   :  { %20 = vst.msk [vmem:[#allocation0] sm:$0x1] %vm19_vm2, %v18_v7  }
  0x82   :  { %26 = vst.msk [vmem:[#allocation0] sm:$0x1] %vm25_vm3, %v24_v6  }
  0x89   :  { %v30_v8 = vld [vmem:[#allocation0] sm:$0x1] }
  0x8a   :  { %32 = vst [vmem:[%s56_s1] sm:$0x1] %v30_v8 }

// kernel: classifier_forward.1
= control target key start
LH: loop header
LB: loop body
LE: loop exit
PB: predicated region body
PF: predicated region fallthrough
CT: control target
= control target key end

     0   :  { %v333_v0 = vmov 0.0|0.0   ;;  %vm334_vm0 = vmmov 0   ;;  %v335_v4 = vmov 0.0   ;;  %vm126_vm1 = vcmask 523264   ;;  %s450_s1 = inlined_call_operand.vmem [shape: f32[128,64], index: 1, kind: input, shape index: {}]   ;;  %s451_s3 = inlined_call_operand.vmem [shape: f32[64,4], index: 3, kind: input, shape index: {}]   ;;  %s452_s0 = inlined_call_operand.vmem [shape: f32[2,128], index: 0, kind: input, shape index: {}]   ;;  %s453_s2 = inlined_call_operand.vmem [shape: f32[1,64], index: 2, kind: input, shape index: {}]   ;;  %s454_s4 = inlined_call_operand.<no memory space> [shape: f32[1,1], index: 4, kind: input, shape index: {}]   ;;  %s455_s5 = inlined_call_operand.vmem [shape: f32[2,4], index: 5, kind: output, shape index: {}]  }
   0x1   :  { %292 = vmatprep.subr.bf16.mxu0 %v333_v0  ;;  %v22_v1 = vld [vmem:[%s450_s1] sm:$0xff]  ;;  %v23_v2 = vld [vmem:[%s450_s1 + $0x8] sm:$0xff]  ;;  %v24_v3 = vld [vmem:[%s450_s1 + $0x10] sm:$0xff]  ;;  %270 = vmatprep.mubr.msk.f32.mxu0 %vm334_vm0, %v335_v4  ;;  %v125_v44 = vstv %s454_s4  ;;  %vm204_vm2 = vcmask 25600  }
   0x2   :  { %v293_v5 = vpack.c.bf16 %v23_v2, %v22_v1  ;;  %v25_v6 = vld [vmem:[%s450_s1 + $0x18] sm:$0xff]  ;;  %316 = vmatprep.subr.bf16.mxu1 %v333_v0  ;;  %289 = vmatprep.mubr.msk.f32.mxu1 %vm334_vm0, %v335_v4  ;;  %v26_v8 = vld [vmem:[%s450_s1 + $0x20] sm:$0xff]  ;;  %v27_v9 = vld [vmem:[%s450_s1 + $0x28] sm:$0xff] }
   0x3   :  { %v296_v7 = vpack.c.bf16 %v25_v6, %v24_v3  ;;  %v116_v10 = vld [vmem:[%s451_s3] sm:$0xff]  ;;  %v117_v11 = vld [vmem:[%s451_s3 + $0x8] sm:$0xff]  ;;  %v118_v12 = vld [vmem:[%s451_s3 + $0x10] sm:$0xff]  ;;  %v299_v14 = vpack.c.bf16 %v27_v9, %v26_v8 }
   0x4   :  { %294 = vmatpush3.bf16.msra.mxu0 %v293_v5  ;;  %v119_v13 = vld [vmem:[%s451_s3 + $0x18] sm:$0xff]  ;;  %v317_v15 = vpack.c.bf16 %v117_v11, %v116_v10  ;;  %v28_v16 = vld [vmem:[%s450_s1 + $0x30] sm:$0xff]  ;;  %v120_v19 = vld [vmem:[%s451_s3 + $0x20] sm:$0xff] }
   0x5   :  { %295 = vmatprep.subr.bf16.mxu0 %v333_v0  ;;  %v29_v17 = vld [vmem:[%s450_s1 + $0x38] sm:$0xff]  ;;  %v320_v18 = vpack.c.bf16 %v119_v13, %v118_v12  ;;  %v121_v20 = vld [vmem:[%s451_s3 + $0x28] sm:$0xff]  ;;  %v30_v22 = vld [vmem:[%s450_s1 + $0x40] sm:$0xff] }
   0x6   :  { %318 = vmatpush3.bf16.msra.mxu1 %v317_v15  ;;  %v302_v21 = vpack.c.bf16 %v29_v17, %v28_v16  ;;  %v31_v23 = vld [vmem:[%s450_s1 + $0x48] sm:$0xff]  ;;  %v323_v24 = vpack.c.bf16 %v121_v20, %v120_v19  ;;  %v32_v26 = vld [vmem:[%s450_s1 + $0x50] sm:$0xff]  ;;  %v33_v27 = vld [vmem:[%s450_s1 + $0x58] sm:$0xff] }
   0x7   :  { %319 = vmatprep.subr.bf16.mxu1 %v333_v0  ;;  %v305_v25 = vpack.c.bf16 %v31_v23, %v30_v22  ;;  %v308_v28 = vpack.c.bf16 %v33_v27, %v32_v26  ;;  %v34_v29 = vld [vmem:[%s450_s1 + $0x60] sm:$0xff]  ;;  %v35_v30 = vld [vmem:[%s450_s1 + $0x68] sm:$0xff]  ;;  %v36_v32 = vld [vmem:[%s450_s1 + $0x70] sm:$0xff] }
   0x8   :  { %297 = vmatpush3.bf16.msra.mxu0 %v296_v7  ;;  %v311_v31 = vpack.c.bf16 %v35_v30, %v34_v29  ;;  %v37_v33 = vld [vmem:[%s450_s1 + $0x78] sm:$0xff]  ;;  %v21_v35 = vld [vmem:[%s452_s0] sm:$0x3]  ;;  %v122_v36 = vld [vmem:[%s451_s3 + $0x30] sm:$0xff] }
   0x9   :  { %298 = vmatprep.subr.bf16.mxu0 %v333_v0  ;;  %v314_v34 = vpack.c.bf16 %v37_v33, %v36_v32  ;;  %v123_v37 = vld [vmem:[%s451_s3 + $0x38] sm:$0xff]  ;;  %v210_v39 = vld [vmem:[%s453_s2] ss:$0 sm:$0xff] }
   0xa   :  { %321 = vmatpush3.bf16.msra.mxu1 %v320_v18  ;;  %v326_v38 = vpack.c.bf16 %v123_v37, %v122_v36 }
   0xb   :  { %322 = vmatprep.subr.bf16.mxu1 %v333_v0 }
   0xc   :  { %300 = vmatpush3.bf16.msra.mxu0 %v299_v14 }
   0xd   :  { %301 = vmatprep.subr.bf16.mxu0 %v333_v0 }
   0xe   :  { %324 = vmatpush3.bf16.msra.mxu1 %v323_v24 }
   0xf   :  { %325 = vmatprep.subr.bf16.mxu1 %v333_v0 }
  0x10   :  { %303 = vmatpush3.bf16.msra.mxu0 %v302_v21 }
  0x11   :  { %304 = vmatprep.subr.bf16.mxu0 %v333_v0 }
  0x12   :  { %327 = vmatpush3.bf16.msra.mxu1 %v326_v38 }
  0x14   :  { %306 = vmatpush3.bf16.msra.mxu0 %v305_v25 }
  0x15   :  { %307 = vmatprep.subr.bf16.mxu0 %v333_v0 }
  0x18   :  { %309 = vmatpush3.bf16.msra.mxu0 %v308_v28 }
  0x19   :  { %310 = vmatprep.subr.bf16.mxu0 %v333_v0 }
  0x1c   :  { %312 = vmatpush3.bf16.msra.mxu0 %v311_v31 }
  0x1d   :  { %313 = vmatprep.subr.bf16.mxu0 %v333_v0 }
  0x20   :  { %315 = vmatpush3.bf16.msra.mxu0 %v314_v34 }
  0x23   :  { %271 = vmatmul.mubr.f32.vlgmr.msra.gmra.mrb[0].mxu0 %v21_v35 }
  0xf6   :  { %v111_v40 = vpop.f32.mrb[0].mxu0 }
  0xf7   :  { %v112_v41 = vadd.f32 %v210_v39, %v111_v40  ;;  %v272_v42 = vpop.f32.mrb[1].mxu0 }
  0xf9   :  { %v115_v43 = vmax.f32 %v112_v41, 0.0 }
  0xfb   :  { %290 = vmatmul.mubr.msk.f32.vlgmr.msra.gmra.mrb[0].mxu1 %vm126_vm1, %v115_v43 }
 0x1ce   :  { %v196_v45 = vpop.f32.mrb[0].mxu1 }
 0x1cf   :  { %v197_v46 = vadd.f32 %v196_v45, %v125_v44  ;;  %v291_v47 = vpop.f32.mrb[1].mxu1 }
 0x1d1   :  { %v200_v48 = vmul.f32 0.5, %v197_v46 }
 0x1d3   :  { %331 = vtanh.f32 %v200_v48 }
 0x1dd   :  { %v332_v49 = vpop.eup %331 }
 0x1de   :  { %v202_v50 = vmul.f32 0.5, %v332_v49 }
 0x1e0   :  { %v203_v51 = vadd.f32 0.5, %v202_v50 }
 0x1e2   :  { %205 = vst.msk [vmem:[%s455_s5] sm:$0x3] %vm204_vm2, %v203_v51 }

</bundles_post_ra>
